<compile_context>
chip_gen: v6e
topology: v6e:2x2x1
jax: 0.10.0
libtpu: 0.0.40
codegen_flags: <defaults>
</compile_context>

<pallas_src>
import functools

import jax
import jax.numpy as jnp
from jax.experimental import pallas as pl
from jax.experimental.pallas import tpu as pltpu


def _device_kind():
    try:
        return jax.devices()[0].device_kind.lower()
    except Exception:
        return ""


# ----------------------------------------------------------------------------
# Kernel 1: pairwise squared distances, tiled over query rows.
#   dists[b, i, j] = sq_i + sq_j - 2 * <p_i, p_j>, computed as ONE matmul of
#   augmented rows:  [-2p_i, 1, sq_i] . [p_j, sq_j, 1]
# The "all points" operand is pre-transposed in the wrapper so the kernel is a
# standard (tq,8)@(8,N) dot (no transposed-RHS lowering), with N lane-resident
# for both the RHS load and the (tq,N) output store.
# ----------------------------------------------------------------------------
def _pairwise_dist_kernel(pq_ref, pat_ref, o_ref):
    # pq_ref : (1, TQ, 8) query rows [-2p, 1, |p|^2, 0...]
    # pat_ref: (1, 8, N)  all rows   [  p, |p|^2, 1, 0...] transposed
    o_ref[0] = jnp.dot(pq_ref[0], pat_ref[0], preferred_element_type=jnp.float32)


def pairwise_sq_dists(pos, *, tq=None):
    """pos: (B, N, 3) float32 -> (B, N, N) squared distances."""
    B, N, D = pos.shape
    assert D + 2 <= 8
    tq = N if tq is None else tq
    assert N % tq == 0, "query tile must divide N"
    sq = jnp.sum(pos * pos, axis=-1, keepdims=True)                 # (B, N, 1)
    one = jnp.ones_like(sq)
    pad = jnp.zeros((B, N, 8 - D - 2), pos.dtype)
    p_all = jnp.concatenate([pos, sq, one, pad], axis=-1)           # (B, N, 8)
    p_all_t = jnp.transpose(p_all, (0, 2, 1))                       # (B, 8, N)
    p_qry = jnp.concatenate([-2.0 * pos, one, sq, pad], axis=-1)    # (B, N, 8)
    return pl.pallas_call(
        _pairwise_dist_kernel,
        out_shape=jax.ShapeDtypeStruct((B, N, N), jnp.float32),
        grid_spec=pltpu.PrefetchScalarGridSpec(
            num_scalar_prefetch=0,
            grid=(B, N // tq),
            in_specs=[pl.BlockSpec((1, tq, 8), lambda b, q: (b, q, 0)),
                      pl.BlockSpec((1, 8, N), lambda b, q: (b, 0, 0))],
            out_specs=pl.BlockSpec((1, tq, N), lambda b, q: (b, q, 0)),
        ),
        compiler_params=pltpu.CompilerParams(
            dimension_semantics=("parallel", "parallel")),
    )(p_qry, p_all_t)


# ----------------------------------------------------------------------------
# Kernel 2: fused LocalConvNet trunk.
#   per-point local MLP -> in-kernel one-hot kNN gather (bf16 MXU matmul) ->
#   max over K -> glb MLP -> combined MLP (concat done as split matmul) ->
#   max over K -> combined_glb MLP.
# One grid step processes G batches folded into the row dimension; the one-hot
# is block-diagonal because idx was pre-offset by (local batch)*N in the wrapper.
# All channel widths are zero-padded to a uniform P so the weight slab is a
# single (9, P, P) array and no lane slicing is ever needed in-kernel.
# ----------------------------------------------------------------------------
def _trunk_kernel(idx_ref, x_ref, w_ref, b_ref, o_ref, *, compute_dtype):
    # idx_ref: (1, G*N*K, 1) int32  kNN indices pre-offset by (local batch)*N
    # x_ref  : (1, G*N, P)   bf16   node features, channels zero-padded to P
    # w_ref  : (9, P, P)     bf16   folded conv+BN weights, zero-padded to (P, P)
    # b_ref  : (8, P)        f32    folded biases, zero-padded to P
    # o_ref  : (1, G*N, P)   f32    full padded output (wrapper slices to C)
    _, GN, P = x_ref.shape
    GNK = idx_ref.shape[1]
    K = GNK // GN
    f32, bf16 = jnp.float32, jnp.bfloat16
    ct = compute_dtype                               # bf16 on v6e/v7x, f32 on v5e

    biases = b_ref[...]                              # (8, P) f32

    def lin(h, wi, bi, out_dtype=f32):               # (M, P) -> (M, P)
        hb = h if h.dtype == bf16 else h.astype(bf16)
        out = jnp.dot(hb, w_ref[wi], preferred_element_type=f32)
        if bi is not None:
            out = out + biases[bi:bi + 1, :]
        return out.astype(out_dtype)

    # local_feat_transformation, applied per point *before* the gather
    # (row-wise 1x1 conv commutes with a row gather -> K x less matmul work).
    h = jnp.maximum(lin(x_ref[0], 0, 0), 0.0)                 # (GN, P) f32
    h = lin(h, 1, 1, out_dtype=bf16)                          # (GN, P) bf16, last_act=False

    # In-kernel kNN gather as a bf16 one-hot matmul on the MXU, in standard
    # non-transposed (GNK, GN)@(GN, P) orientation (rows = gathered rows).
    eq = (jax.lax.broadcasted_iota(jnp.int32, (GNK, GN), 1) == idx_ref[0])
    onehot = jnp.where(eq, 1.0, 0.0).astype(bf16)             # (GNK, GN) bf16, exact 0/1
    hg = jnp.dot(onehot, h, preferred_element_type=f32).astype(ct)   # (GNK, P)

    # glb_feat_transformation on the per-point max over the neighborhood.
    glb = jnp.max(hg.reshape(GN, K, P), axis=1)               # (GN, P)
    g = jnp.maximum(lin(glb, 2, 2), 0.0)                      # [C -> 2C]
    g = lin(g, 3, 3)                                          # [2C -> C] f32

    # combined_feat_transformation: concat([hg, repeat(g)]) @ cw0 computed as
    # hg @ cw0a + g @ cw0b (identical math, no in-kernel concat).
    ca = lin(hg, 4, None, out_dtype=ct)                       # (GNK, P)
    cb = lin(g, 5, 4, out_dtype=ct)                           # (GN, P)
    c = jnp.maximum(ca.reshape(GN, K, P) + cb[:, None, :], 0.0)
    c = lin(c.reshape(GNK, P), 6, 5, out_dtype=ct)            # (GNK, P)

    # combined_glb_feat_transformation on the max over the neighborhood.
    cg = jnp.max(c.reshape(GN, K, P), axis=1)                 # (GN, P)
    d = jnp.maximum(lin(cg, 7, 6), 0.0)                       # [C -> 2C]
    d = lin(d, 8, 7)                                          # [2C -> C] f32

    o_ref[0] = d                                              # full padded width


def local_conv_forward(x, idx, wslab, bslab, *, out_dim,
                       batches_per_step=None, compute_dtype=None):
    """x: (B,N,Cin) f32, idx: (B,N,K) int32, wslab: (9,P,P) bf16, bslab: (8,P) f32."""
    B, N, Cin = x.shape
    K = idx.shape[-1]
    P = wslab.shape[-1]
    NK = N * K

    kind = _device_kind()
    if batches_per_step is None:
        # v7x has 2 TensorCores -> keep one grid step per batch so both cores run.
        # v5e/v6e are single-TC -> fold all batches into one fat step (fewer steps,
        # bigger matmul M, gather contraction dim B*N instead of N).
        batches_per_step = 1 if "v7" in kind else B
    if compute_dtype is None:
        # bf16 elementwise intermediates only where the VPU has native bf16.
        compute_dtype = jnp.bfloat16 if ("v6" in kind or "v7" in kind) else jnp.float32

    G = batches_per_step
    assert B % G == 0
    steps = B // G

    # Zero-pad channels to P and cast to bf16 (MXU operand dtype); padding lanes
    # stay exactly zero through every layer because weight/bias pads are zero.
    x_pad = jnp.zeros((B, N, P), jnp.bfloat16).at[..., :Cin].set(x.astype(jnp.bfloat16))
    x_flat = x_pad.reshape(steps, G * N, P)
    # Offset indices by (local batch)*N so the folded one-hot is block-diagonal,
    # and lay them out as a column so the in-kernel iota compare needs no transpose.
    offs = (jnp.arange(B, dtype=jnp.int32) % G) * N
    idx_col = (idx.astype(jnp.int32) + offs[:, None, None]).reshape(steps, G * NK, 1)

    kernel = functools.partial(_trunk_kernel, compute_dtype=compute_dtype)
    out = pl.pallas_call(
        kernel,
        out_shape=jax.ShapeDtypeStruct((steps, G * N, P), jnp.float32),
        grid_spec=pltpu.PrefetchScalarGridSpec(
            num_scalar_prefetch=0,
            grid=(steps,),
            in_specs=[
                pl.BlockSpec((1, G * NK, 1), lambda s: (s, 0, 0)),
                pl.BlockSpec((1, G * N, P), lambda s: (s, 0, 0)),
                pl.BlockSpec((9, P, P), lambda s: (0, 0, 0)),
                pl.BlockSpec((8, P), lambda s: (0, 0)),
            ],
            out_specs=pl.BlockSpec((1, G * N, P), lambda s: (s, 0, 0)),
        ),
        compiler_params=pltpu.CompilerParams(dimension_semantics=("parallel",)),
    )(idx_col, x_flat, wslab, bslab)
    # Un-fold batches and drop channel padding in the wrapper (cheap XLA slice)
    # instead of a masked 32-lane store inside the kernel.
    return out.reshape(B, N, P)[..., :out_dim]


# ----------------------------------------------------------------------------
# Deterministic parameter construction: Conv2d(1x1) + BatchNorm2d (eval mode)
# folded into a single (in,out) weight and (1,out) bias per layer.
# ----------------------------------------------------------------------------
def _folded_layer(key, in_dim, out_dim, eps=1e-5):
    kW, kb, kg, kbt, km, kv = jax.random.split(key, 6)
    W = 0.1 * jax.random.normal(kW, (out_dim, in_dim), jnp.float32)
    b = 0.1 * jax.random.normal(kb, (out_dim,), jnp.float32)
    gamma = 1.0 + 0.1 * jax.random.normal(kg, (out_dim,), jnp.float32)
    beta = 0.1 * jax.random.normal(kbt, (out_dim,), jnp.float32)
    mean = 0.1 * jax.random.normal(km, (out_dim,), jnp.float32)
    var = 1.0 + 0.1 * jnp.abs(jax.random.normal(kv, (out_dim,), jnp.float32))
    scale = gamma / jnp.sqrt(var + eps)
    W_eff = (W * scale[:, None]).T                       # (in, out)
    b_eff = ((b - mean) * scale + beta).reshape(1, out_dim)
    return W_eff, b_eff


def init_params(key, node_feat_dim, mlp_dims):
    assert len(mlp_dims) == 2, "this synthetic script instantiates 2 local MLP layers"
    C = mlp_dims[-1]
    specs = [("l0", node_feat_dim, mlp_dims[0]), ("l1", mlp_dims[0], mlp_dims[1]),
             ("g0", C, 2 * C), ("g1", 2 * C, C),
             ("c0", 2 * C, C), ("c1", C, C),
             ("d0", C, 2 * C), ("d1", 2 * C, C)]
    keys = jax.random.split(key, len(specs))
    p = {}
    for k, (name, di, do) in zip(keys, specs):
        W, b = _folded_layer(k, di, do)
        p[name[0] + "w" + name[1]] = W
        p[name[0] + "b" + name[1]] = b
    # split combined layer-0 weight (2C,C) to avoid in-kernel concat (same math)
    p["cw0a"] = p["cw0"][:C]
    p["cw0b"] = p["cw0"][C:]
    return p


def pack_params(p, pad_dim):
    """Pack all folded layers into one (9,P,P) bf16 weight slab + (8,P) f32 bias slab."""
    P = pad_dim

    def padw(w):
        return jnp.zeros((P, P), jnp.float32).at[:w.shape[0], :w.shape[1]].set(w)

    def padb(b):
        return jnp.zeros((P,), jnp.float32).at[:b.shape[1]].set(b[0])

    w_names = ["lw0", "lw1", "gw0", "gw1", "cw0a", "cw0b", "cw1", "dw0", "dw1"]
    b_names = ["lb0", "lb1", "gb0", "gb1", "cb0", "cb1", "db0", "db1"]
    wslab = jnp.stack([padw(p[n]) for n in w_names]).astype(jnp.bfloat16)   # (9, P, P)
    bslab = jnp.stack([padb(p[n]) for n in b_names])                        # (8, P) f32
    return wslab, bslab


# ----------------------------------------------------------------------------
# Plain-JAX reference of the original module order (gather -> MLPs), mirroring
# the kernel's bf16-operand / f32-accumulate matmul precision. Sanity check only.
# ----------------------------------------------------------------------------
def _reference_trunk(x, idx, p):
    bf16, f32 = jnp.bfloat16, jnp.float32

    def lin(h, w, b):
        return jnp.dot(h.astype(bf16), w.astype(bf16), preferred_element_type=f32) + b[0]

    gathered = jax.vmap(lambda xb, ib: xb[ib])(x, idx)               # (B, N, K, Cin)
    h = jnp.maximum(lin(gathered, p["lw0"], p["lb0"]), 0.0)
    h = lin(h, p["lw1"], p["lb1"])                                   # (B, N, K, C)
    glb = jnp.max(h, axis=2, keepdims=True)
    g = jnp.maximum(lin(glb, p["gw0"], p["gb0"]), 0.0)
    g = lin(g, p["gw1"], p["gb1"])                                   # (B, N, 1, C)
    comb = jnp.concatenate([h, jnp.broadcast_to(g, h.shape)], axis=-1)
    c = jnp.maximum(lin(comb, p["cw0"], p["cb0"]), 0.0)
    c = lin(c, p["cw1"], p["cb1"])
    cg = jnp.max(c, axis=2)
    d = jnp.maximum(lin(cg, p["dw0"], p["db0"]), 0.0)
    return lin(d, p["dw1"], p["db1"])                                # (B, N, C)


if __name__ == "__main__":
    B, N, K = 2, 64, 16
    node_feat_dim = 16
    mlp_dims = [32, 32]
    C = mlp_dims[-1]
    # uniform padded channel width used inside the trunk kernel (widest layer)
    P = max(2 * C, node_feat_dim, max(mlp_dims))
    P = ((P + 7) // 8) * 8

    key = jax.random.PRNGKey(0)
    kx, kpos, kw = jax.random.split(key, 3)
    x = jax.random.normal(kx, (B, N, node_feat_dim), jnp.float32)
    pos = jax.random.normal(kpos, (B, N, 3), jnp.float32)
    params = init_params(kw, node_feat_dim, mlp_dims)
    wslab, bslab = pack_params(params, P)

    # --- forward ---
    dists = pairwise_sq_dists(pos)                               # Pallas: (B, N, N)
    # TODO(synk): for large N, fuse the top-k (running K-best per query tile) into
    # the distance kernel instead of materializing (B, N, N) + lax.top_k here.
    _, idx = jax.lax.top_k(-dists, K)                            # (B, N, K) nearest-k
    # relative_pos=False (default) branch of the PyTorch forward is used here.
    out = local_conv_forward(x, idx, wslab, bslab, out_dim=C)    # Pallas: (B, N, C)
    out = jax.block_until_ready(out)

    # --- sanity checks against plain-JAX references of the same math ---
    sq = jnp.sum(pos * pos, axis=-1)
    dists_ref = sq[:, :, None] + sq[:, None, :] - 2.0 * jnp.einsum("bid,bjd->bij", pos, pos)
    assert jnp.allclose(dists, dists_ref, atol=1e-3, rtol=1e-3)
    out_ref = _reference_trunk(x, idx, params)
    assert out.shape == (B, N, C)
    assert jnp.allclose(out, out_ref, atol=2e-2, rtol=2e-2), (
        float(jnp.max(jnp.abs(out - out_ref))))

    print("KERNEL_OK")
</pallas_src>

<mosaic_0001>
module attributes {stable_mosaic.version = 11 : i64} {
  func.func @_pairwise_dist_kernel(%arg0: i32, %arg1: i32, %arg2: memref<1x64x8xf32, #tpu.memory_space<vmem>>, %arg3: memref<1x8x64xf32, #tpu.memory_space<vmem>>, %arg4: memref<1x64x64xf32, #tpu.memory_space<vmem>>) attributes {dimension_semantics = [#tpu.dimension_semantics<parallel>, #tpu.dimension_semantics<parallel>], iteration_bounds = array<i64: 2, 1>, scalar_prefetch = 0 : i64, scratch_operands = 0 : i64, tpu.core_type = #tpu.core_type<tc>, window_params = [{transform_indices = @transform_0, window_bounds = array<i64: 1, 64, 8>}, {transform_indices = @transform_1, window_bounds = array<i64: 1, 8, 64>}, {transform_indices = @transform_2, window_bounds = array<i64: 1, 64, 64>}]} {
    %c0 = arith.constant 0 : index
    %c0_0 = arith.constant 0 : index
    %c0_1 = arith.constant 0 : index
    %0 = vector.load %arg2[%c0, %c0_0, %c0_1] : memref<1x64x8xf32, #tpu.memory_space<vmem>>, vector<1x64x8xf32>
    %1 = vector.shape_cast %0 : vector<1x64x8xf32> to vector<64x8xf32>
    %c0_2 = arith.constant 0 : index
    %c0_3 = arith.constant 0 : index
    %c0_4 = arith.constant 0 : index
    %2 = vector.load %arg3[%c0_2, %c0_3, %c0_4] : memref<1x8x64xf32, #tpu.memory_space<vmem>>, vector<1x8x64xf32>
    %3 = vector.shape_cast %2 : vector<1x8x64xf32> to vector<8x64xf32>
    %cst = arith.constant dense<0.000000e+00> : vector<64x64xf32>
    %4 = tpu.matmul %1, %3, %cst {dimension_numbers = #tpu.dot_dimension_numbers<[1], [0], [0], [1], [0, 0, 1, 1], [], []>} : vector<64x8xf32>, vector<8x64xf32>, vector<64x64xf32> -> vector<64x64xf32>
    %c0_5 = arith.constant 0 : index
    %c0_6 = arith.constant 0 : index
    %c0_7 = arith.constant 0 : index
    %5 = vector.load %arg4[%c0_5, %c0_6, %c0_7] : memref<1x64x64xf32, #tpu.memory_space<vmem>>, vector<1x64x64xf32>
    %6 = vector.shape_cast %5 : vector<1x64x64xf32> to vector<64x64xf32>
    %7 = vector.shape_cast %4 : vector<64x64xf32> to vector<1x64x64xf32>
    tpu.vector_store %arg4[%c0_5, %c0_6, %c0_7], %7 {strides = array<i32>} : memref<1x64x64xf32, #tpu.memory_space<vmem>>, vector<1x64x64xf32>,
    return
  }
  func.func @transform_0(%arg0: i32, %arg1: i32) -> (i32, i32, i32) {
    %c0_i32 = arith.constant 0 : i32
    %c0_i32_0 = arith.constant 0 : i32
    return %arg0, %arg1, %c0_i32 : i32, i32, i32
  }
  func.func @transform_1(%arg0: i32, %arg1: i32) -> (i32, i32, i32) {
    %c0_i32 = arith.constant 0 : i32
    %c0_i32_0 = arith.constant 0 : i32
    %c0_i32_1 = arith.constant 0 : i32
    return %arg0, %c0_i32, %c0_i32_0 : i32, i32, i32
  }
  func.func @transform_2(%arg0: i32, %arg1: i32) -> (i32, i32, i32) {
    %c0_i32 = arith.constant 0 : i32
    %c0_i32_0 = arith.constant 0 : i32
    return %arg0, %arg1, %c0_i32 : i32, i32, i32
  }
}

</mosaic_0001>

<bundles_post_ra>
// kernel: tpu_custom_call.1
= control target key start
LH: loop header
LB: loop body
LE: loop exit
PB: predicated region body
PF: predicated region fallthrough
CT: control target
= control target key end

     0   :  { %7 = vsyncpa [#allocation3], 0  ;;  %s780_s0 = inlined_call_operand.vmem [shape: f32[2,64,8], index: 0, kind: input, shape index: {}]   ;;  %s781_s1 = inlined_call_operand.vmem [shape: f32[2,8,64], index: 1, kind: input, shape index: {}]   ;;  %s782_s2 = inlined_call_operand.hbm [shape: f32[2,64,64], index: 2, kind: output, shape index: {}]  }
   0x1   :  { %9 = vsyncpa [#allocation3 + $0x1], 0  ;;  %s647_s9 = smov 0   ;;  %s649_s10 = smov 0  }
   0x2   :  { %s651_s11 = smov 0   ;;  %s653_s12 = smov 0  }
   0x3   :  { %s655_s13 = smov 0   ;;  %s657_s14 = smov 0  }
   0x4 LB: > { %s445_s15 = sadd.s32 4294967295, %s627_s14   ;;  %s446_s16 = sadd.s32 4294967294, %s627_s14   ;;  %s627_s14 = sphi %s657_s14, %s15_s14   ;;  %s623_s13 = sphi %s655_s13, %s789_s13   ;;  %s619_s12 = sphi %s653_s12, %s788_s12   ;;  %s615_s11 = sphi %s651_s11, %s787_s11   ;;  %s611_s10 = sphi %s649_s10, %s786_s10   ;;  %s607_s9 = sphi %s647_s9, %s785_s9  }
   0x5   : > { %s27_s17 = sadd.s32 1, %s623_s13  ;;  %s90_s18 = sadd.s32 1, %s615_s11 }
   0x6   : > { %p29_p0 = scmp.ge.s32.totalorder %s27_s17, 2  ;;  %p100_p1 = scmp.ne.s32.totalorder %s615_s11, %s611_s10 }
   0x7   : > { %p101_p2 = scmp.eq.s32.totalorder %s445_s15, 1  ;;  %p106_p3 = scmp.ne.s32.totalorder %s611_s10, %s607_s9 }
   0x8   : > { %s791_s17 = smov (%p29_p0, %s27_s17), 0  ;;  %p107_p5 = scmp.eq.s32.totalorder %s446_s16, 1 }
   0x9   : > { %p687_p4 = por %p101_p2, %p100_p1  ;;  %s85_s20 = ssub.s32 %s623_s13, %s791_s17 }
   0xa   : > { %p449_p6 = scmp.ge.s32.totalorder %s627_s14, 1  ;;  %p88_p7 = scmp.eq.s32.totalorder %s85_s20, 0 }
   0xb   : > { %p694_p8 = por %p107_p5, %p106_p3  ;;  %p145_p9 = scmp.lt.s32.totalorder %s627_s14, 3 }
   0xc   : > { %s700_s22 = scalar_select %p88_p7, %s615_s11, %s90_s18  }
   0xd   : > { %p146_p10 = pnand %p449_p6, %p145_p9 }
   0xe   : > { %p176_p11 = scmp.lt.s32.totalorder (!%p146_p10), %s619_s12, 1  ;;  %s172_s4 = sand.u32 (!%p146_p10), 1, %s611_s10  }
   0xf   : > { %149 = sbr.rel (%p146_p10) target bundleno = 241 (0xf1), region = 28  ;;  %s450_s5 = sshll.u32 (!%p146_p10), %s172_s4, 6 }
  0x10   : > { %s174_s6 = scalar_lea.vmem (!%p146_p10), [#allocation2], %s450_s5  ;;  %s468_s7 = sshll.u32 (!%p146_p10), %s619_s12, 10 }
  0x11   : > { %s354_s8 = sshll.u32 (!%p146_p10), %s174_s6, 4  ;;  %s727_s18 = scalar_lea.hbm (!%p146_p10), %s782_s2, %s468_s7  ;;  %s729_s8 = int_to_ptr.vmem [resolvable:$true] %s354_s8 }
  0x12   : > { %s551_s20 = scalar_lea.vmem (!%p146_p10), %s729_s8, 1024 }
  0x13   : > { %p552_p12 = scmp.ne.s32.totalorder (!%p146_p10), %s729_s8, %s551_s20 }
  0x14   : > { %s177_s23 = scalar_select %p176_p11, %s619_s12, 1  ;;  %vm199_vm0 = vcmask 64512   ;;  %vm329_vm1 = vcmask 523264  }
  0x15   : > { %s735_s12 = scalar_lea.sflag [#allocation3], %s172_s4  ;;  %p553_p13 = pnand %p552_p12, %p687_p4 }
  0x16   : > { %s467_s24 = sshll.u32 %s177_s23, 6  ;;  %s453_s25 = sshll.u32 %s177_s23, 3 }
  0x17   : > { %s183_s28 = scalar_lea.vmem %s780_s0, %s467_s24  ;;  %s188_s3 = scalar_lea.vmem %s781_s1, %s453_s25 }
  0x18   : > { %v198_v0 = vld [vmem:[%s188_s3] sm:$0xff]  ;;  %v191_v3 = vld [vmem:[%s183_s28 + $0x8] sm:$0xff]  ;;  %v192_v5 = vld [vmem:[%s183_s28 + $0x10] sm:$0xff]  ;;  %p554_p0 = pneg %p553_p13  ;;  %s629_s23 = smov [#allocation2]  }
  0x19   : > { %v190_v1 = vld [vmem:[%s183_s28] sm:$0xff]  ;;  %478 = vmatprep.subr.mxu0 %v198_v0  ;;  %492 = vmatprep.subr.mxu1 %v198_v0  ;;  %v195_v4 = vld [vmem:[%s183_s28 + $0x28] sm:$0xff]  ;;  %v196_v6 = vld [vmem:[%s183_s28 + $0x30] sm:$0xff]  ;;  %s555_s24 = sshll.u32 %s629_s23, 4  ;;  %s556_s24 = int_to_ptr.vmem [resolvable:$false] %s555_s24 }
  0x1a   : > { %v194_v2 = vld [vmem:[%s183_s28 + $0x20] sm:$0xff]  ;;  %479 = vmatpush3.msra.mxu0 %v198_v0  ;;  %493 = vmatpush3.msra.mxu1 %v198_v0  ;;  %v193_v7 = vld [vmem:[%s183_s28 + $0x18] sm:$0xff]  ;;  %s557_s25 = scalar_lea.vmem %s556_s24, 2048  ;;  %p558_p1 = scmp.lt.s32.totalorder %s729_s8, %s556_s24 }
  0x1b   : > { %480 = vmatprep.mubr.msk.f32.mxu0 %vm199_vm0, %v190_v1  ;;  %486 = vmatprep.mubr.msk.f32.mxu1 %vm199_vm0, %v194_v2  ;;  %v197_v8 = vld [vmem:[%s183_s28 + $0x38] sm:$0xff]  ;;  %p559_p2 = scmp.lt.s32.totalorder %s557_s25, %s551_s20 }
  0x1c   : > { %481 = vmatmul.mubr.msk.f32.vlgmr.msra.gmra.mxu0 %vm199_vm0, %v191_v3  ;;  %487 = vmatmul.mubr.msk.f32.vlgmr.msra.gmra.mxu1 %vm199_vm0, %v195_v4 }
  0x1d   : > { %483 = vmatprep.mubr.msk.f32.mxu0 %vm199_vm0, %v192_v5  ;;  %489 = vmatprep.mubr.msk.f32.mxu1 %vm199_vm0, %v196_v6  ;;  %p560_p3 = por %p559_p2, %p558_p1 }
  0x1f   : > { %p561_p5 = pnand %p560_p3, %p554_p0 }
  0x20   : > { %484 = vmatmul.mubr.msk.f32.gmra.mxu0 %vm199_vm0, %v193_v7  ;;  %490 = vmatmul.mubr.msk.f32.gmra.mxu1 %vm199_vm0, %v197_v8 }
  0xdc   : > { %v482_v9 = vpop.f32.mrf.mxu0  ;;  %v488_v10 = vpop.f32.mrf.mxu1 }
  0xdd   : > { %331 = vst.msk [vmem:[%s174_s6 + $0x8] sm:$0xff] %vm329_vm1, %v482_v9  ;;  %335 = vst.msk [vmem:[%s174_s6 + $0x28] sm:$0xff] %vm329_vm1, %v488_v10 }
  0xde   : > { %v290_v11 = vpop.f32.mrf.mxu0  ;;  %v310_v12 = vpop.f32.mrf.mxu1 }
  0xdf   : > { %330 = vst.msk [vmem:[%s174_s6] sm:$0xff] %vm329_vm1, %v290_v11  ;;  %334 = vst.msk [vmem:[%s174_s6 + $0x20] sm:$0xff] %vm329_vm1, %v310_v12 }
  0xe0   : > { %v485_v13 = vpop.f32.mrf.mxu0  ;;  %v491_v14 = vpop.f32.mrf.mxu1 }
  0xe1   : > { %333 = vst.msk [vmem:[%s174_s6 + $0x18] sm:$0xff] %vm329_vm1, %v485_v13  ;;  %337 = vst.msk [vmem:[%s174_s6 + $0x38] sm:$0xff] %vm329_vm1, %v491_v14 }
  0xe2   : > { %v300_v15 = vpop.f32.mrf.mxu0  ;;  %v320_v16 = vpop.f32.mrf.mxu1 }
  0xe3   : > { %332 = vst.msk [vmem:[%s174_s6 + $0x10] sm:$0xff] %vm329_vm1, %v300_v15  ;;  %336 = vst.msk [vmem:[%s174_s6 + $0x30] sm:$0xff] %vm329_vm1, %v320_v16 }
  0xe4   : > { %564 = shalt.err (!%p561_p5)
}
  0xe5   : > { %s565_s26 = scalar_lea.hbm %s727_s18, 1024  ;;  %s569_s29 = scalar_lea.hbm %s782_s2, 2048 }
  0xe6   : > { %p566_p6 = scmp.ne.s32.totalorder %s727_s18, %s565_s26  ;;  %p570_p10 = scmp.lt.s32.totalorder %s727_s18, %s782_s2 }
  0xe7   : > { %p571_p11 = scmp.lt.s32.totalorder %s569_s29, %s565_s26 }
  0xe8   : > { %p567_p7 = pnand %p566_p6, %p687_p4 }
  0xe9   : > { %p572_p12 = por %p571_p11, %p570_p10 }
  0xea   : > { %p568_p9 = pneg %p567_p7 }
  0xec   : > { %p573_p13 = pnand %p572_p12, %p568_p9 }
  0xee   : > { %576 = shalt.err (!%p573_p13)
}
  0xef   : > { %s630_s4 = smov 128   ;;  %s631_s5 = smov 8  }
  0xf0   : > { %494 = dma.vmem_to_hbm [thread:$0]  (%p687_p4), %s729_s8, 1024, %s727_s18, %s735_s12, %s630_s4, %s630_s4, %s631_s5  }
  0xf1 PF: > { %p500_p0 = scmp.ge.s32.totalorder %s627_s14, 2  ;;  %s369_s6 = sand.u32 1, %s607_s9  }
  0xf2   : > { %s370_s7 = scalar_lea.sflag [#allocation3], %s369_s6 }
  0xf3   : > { %p497_p1 = pnand %p500_p0, %p694_p8 }
  0xf5   : > { %p498_p2 = pneg %p497_p1 }
  0xf7   : > { %602 = dma.done.wait (%p498_p2), %s370_s7, 1024  }
  0xf8   : > { %604 = vsyncadd (%p498_p2), %s370_s7, 4294966272  ;;  %s15_s14 = sadd.s32 1, %s627_s14   ;;  %s785_s9 = smov %s611_s10 }
  0xf9   : > { %p12_p3 = scmp.ge.s32.totalorder %s15_s14, 4   ;;  %s786_s10 = smov %s615_s11 }
  0xfa   : > { %s787_s11 = smov %s700_s22  ;;  %s788_s12 = smov %s623_s13 }
  0xfb   : > { %s789_s13 = smov %s791_s17  ;;  %14 = sbr.rel (!%p12_p3) target bundleno = 4 (0x4), region = 66 }
 0x100   :  { %375 = vsyncpa [#allocation3], 1 }
 0x101   :  { %377 = vsyncpa [#allocation3 + $0x1], 1 }

</bundles_post_ra>
